<compile_context>
chip_gen: v5e
topology: v5e:2x2
jax: 0.10.0
libtpu: 0.0.40
codegen_flags: <defaults>
</compile_context>

<pallas_src>
import math
import functools

import jax
import jax.numpy as jnp
from jax.experimental import pallas as pl
from jax.experimental.pallas import tpu as pltpu


def _linear_add_relu_kernel(xt_ref, w_ref, b_ref, yt_ref):
    """yt[n, :] = relu(b[n] + sum_k w[n, k] * xt[k, :]).

    xt_ref: [K, tm]  f32   lane-dense block of x^T (streamed, double-buffered)
    w_ref:  [N, K]   f32   native nn.Linear weight layout (VMEM resident)
    b_ref:  [N, 1]   f32   bias with the scalar `other` already folded in
    yt_ref: [N, tm]  f32 / bf16  lane-dense block of y^T
    """
    x = xt_ref[...]                                     # [K, tm]
    w = w_ref[...]                                      # [N, K]
    n_out, tm = yt_ref.shape
    k_in = x.shape[0]

    # Bias (+other) broadcast along lanes once per tile (f32 accumulator).
    acc = jnp.broadcast_to(b_ref[...], (n_out, tm))     # [N, tm]

    # K unrolled VPU FMAs instead of an MXU dot (which would be >95% padding
    # at K=5 / N=10).  [N,1] * [1,tm] broadcasts to [N,tm].
    for k in range(k_in):
        acc = acc + w[:, k:k + 1] * x[k:k + 1, :]

    yt_ref[...] = jnp.maximum(acc, 0.0).astype(yt_ref.dtype)


@functools.partial(jax.jit, static_argnames=("tm", "out_dtype"))
def linear_add_relu(x, weight, bias, other, *, tm=32768, out_dtype=jnp.float32):
    """relu(x @ weight.T + bias + other)  — PyTorch nn.Linear convention.

    x:      [..., K]  feature-last input
    weight: [N, K]    nn.Linear weight (native layout, no transpose needed)
    bias:   [N]
    other:  scalar
    """
    *lead, k_in = x.shape
    n_out = weight.shape[0]
    m = math.prod(lead) if lead else 1

    # Layout plumbing: lane-dense [K, M] input slab / [N, M] output slab.
    xt = x.reshape(m, k_in).T.astype(jnp.float32)            # [K, M]
    w2d = weight.astype(jnp.float32)                         # [N, K]
    b2d = (bias + other).astype(jnp.float32).reshape(n_out, 1)

    # Lane tile: multiple of 128, capped at `tm`, clamped to ~M/2 so the grid
    # has at least 2 steps (lets "parallel" shard across both TCs on v7x).
    half_m = pl.cdiv(m, 2)
    tm_eff = min(tm, ((half_m + 127) // 128) * 128)
    tm_eff = max(128, tm_eff)
    grid_m = pl.cdiv(m, tm_eff)          # ragged last block: reads padded, writes masked

    yt = pl.pallas_call(
        _linear_add_relu_kernel,
        out_shape=jax.ShapeDtypeStruct((n_out, m), out_dtype),
        grid=(grid_m,),
        in_specs=[
            pl.BlockSpec((k_in, tm_eff), lambda i: (0, i)),   # streamed x^T blocks
            pl.BlockSpec((n_out, k_in), lambda i: (0, 0)),    # VMEM-resident weight
            pl.BlockSpec((n_out, 1), lambda i: (0, 0)),       # VMEM-resident bias(+other)
        ],
        out_specs=pl.BlockSpec((n_out, tm_eff), lambda i: (0, i)),
        compiler_params=pltpu.CompilerParams(
            dimension_semantics=("parallel",),   # M axis shards across TCs on v7x
        ),
    )(xt, w2d, b2d)

    return yt.T.reshape(*lead, n_out)


if __name__ == "__main__":
    key = jax.random.PRNGKey(0)
    kx, kw, kb = jax.random.split(key, 3)

    # nn.Linear(5, 10): in_features=5, out_features=10
    in_features, out_features = 5, 10
    other = 1.0

    # Feature-last input consistent with nn.Linear(5, 10); M = 2*4*30 = 240 rows,
    # so the lane tile clamps to 128 and the grid runs 2 steps with a ragged
    # last block (exercises the no-pad / masked-write path).
    x = jax.random.normal(kx, (2, 4, 30, in_features), dtype=jnp.float32)

    # Deterministic params (mimic PyTorch uniform(-1/sqrt(K), 1/sqrt(K)))
    bound = 1.0 / math.sqrt(in_features)
    weight = jax.random.uniform(kw, (out_features, in_features),
                                minval=-bound, maxval=bound, dtype=jnp.float32)
    bias = jax.random.uniform(kb, (out_features,),
                              minval=-bound, maxval=bound, dtype=jnp.float32)

    # f32 path (matches the PyTorch module semantics)
    y = linear_add_relu(x, weight, bias, other)
    jax.block_until_ready(y)

    ref = jnp.maximum(x @ weight.T + bias + other, 0.0)
    assert y.shape == (2, 4, 30, out_features)
    assert jnp.allclose(y, ref, atol=1e-5, rtol=1e-5)

    # Optional bf16 output (halves the dominant HBM write stream).
    y_bf16 = linear_add_relu(x, weight, bias, other, out_dtype=jnp.bfloat16)
    jax.block_until_ready(y_bf16)
    assert jnp.allclose(y_bf16.astype(jnp.float32), ref, atol=2e-2, rtol=2e-2)

    print("KERNEL_OK")
</pallas_src>

<mosaic_0001>
module attributes {stable_mosaic.version = 11 : i64} {
  func.func @_linear_add_relu_kernel(%arg0: i32, %arg1: memref<5x128xf32, #tpu.memory_space<vmem>>, %arg2: memref<10x5xf32, #tpu.memory_space<vmem>>, %arg3: memref<10x1xf32, #tpu.memory_space<vmem>>, %arg4: memref<10x128xf32, #tpu.memory_space<vmem>>) attributes {dimension_semantics = [#tpu.dimension_semantics<parallel>], iteration_bounds = array<i64: 2>, scalar_prefetch = 0 : i64, scratch_operands = 0 : i64, tpu.core_type = #tpu.core_type<tc>, window_params = [{transform_indices = @transform_0, window_bounds = array<i64: 5, 128>}, {pipeline_mode = #tpu.pipeline_mode<synchronous>, transform_indices = @transform_1, window_bounds = array<i64: 10, 5>}, {pipeline_mode = #tpu.pipeline_mode<synchronous>, transform_indices = @transform_2, window_bounds = array<i64: 10, 1>}, {transform_indices = @transform_3, window_bounds = array<i64: 10, 128>}]} {
    %c0 = arith.constant 0 : index
    %c0_0 = arith.constant 0 : index
    %0 = vector.load %arg1[%c0, %c0_0] : memref<5x128xf32, #tpu.memory_space<vmem>>, vector<5x128xf32>
    %c0_1 = arith.constant 0 : index
    %c0_2 = arith.constant 0 : index
    %1 = vector.load %arg2[%c0_1, %c0_2] : memref<10x5xf32, #tpu.memory_space<vmem>>, vector<10x5xf32>
    %c0_3 = arith.constant 0 : index
    %c0_4 = arith.constant 0 : index
    %2 = vector.load %arg3[%c0_3, %c0_4] : memref<10x1xf32, #tpu.memory_space<vmem>>, vector<10x1xf32>
    %3 = vector.shape_cast %2 : vector<10x1xf32> to vector<10x1xf32>
    %4 = vector.broadcast %3 : vector<10x1xf32> to vector<10x128xf32>
    %5 = vector.extract_strided_slice %1 {offsets = [0, 0], sizes = [10, 1], strides = [1, 1]} : vector<10x5xf32> to vector<10x1xf32>
    %6 = vector.extract_strided_slice %0 {offsets = [0, 0], sizes = [1, 128], strides = [1, 1]} : vector<5x128xf32> to vector<1x128xf32>
    %7 = vector.broadcast %5 : vector<10x1xf32> to vector<10x128xf32>
    %8 = vector.broadcast %6 : vector<1x128xf32> to vector<10x128xf32>
    %9 = arith.mulf %7, %8 : vector<10x128xf32>
    %10 = arith.addf %4, %9 : vector<10x128xf32>
    %11 = vector.extract_strided_slice %1 {offsets = [0, 1], sizes = [10, 1], strides = [1, 1]} : vector<10x5xf32> to vector<10x1xf32>
    %12 = vector.extract_strided_slice %0 {offsets = [1, 0], sizes = [1, 128], strides = [1, 1]} : vector<5x128xf32> to vector<1x128xf32>
    %13 = vector.broadcast %11 : vector<10x1xf32> to vector<10x128xf32>
    %14 = vector.broadcast %12 : vector<1x128xf32> to vector<10x128xf32>
    %15 = arith.mulf %13, %14 : vector<10x128xf32>
    %16 = arith.addf %10, %15 : vector<10x128xf32>
    %17 = vector.extract_strided_slice %1 {offsets = [0, 2], sizes = [10, 1], strides = [1, 1]} : vector<10x5xf32> to vector<10x1xf32>
    %18 = vector.extract_strided_slice %0 {offsets = [2, 0], sizes = [1, 128], strides = [1, 1]} : vector<5x128xf32> to vector<1x128xf32>
    %19 = vector.broadcast %17 : vector<10x1xf32> to vector<10x128xf32>
    %20 = vector.broadcast %18 : vector<1x128xf32> to vector<10x128xf32>
    %21 = arith.mulf %19, %20 : vector<10x128xf32>
    %22 = arith.addf %16, %21 : vector<10x128xf32>
    %23 = vector.extract_strided_slice %1 {offsets = [0, 3], sizes = [10, 1], strides = [1, 1]} : vector<10x5xf32> to vector<10x1xf32>
    %24 = vector.extract_strided_slice %0 {offsets = [3, 0], sizes = [1, 128], strides = [1, 1]} : vector<5x128xf32> to vector<1x128xf32>
    %25 = vector.broadcast %23 : vector<10x1xf32> to vector<10x128xf32>
    %26 = vector.broadcast %24 : vector<1x128xf32> to vector<10x128xf32>
    %27 = arith.mulf %25, %26 : vector<10x128xf32>
    %28 = arith.addf %22, %27 : vector<10x128xf32>
    %29 = vector.extract_strided_slice %1 {offsets = [0, 4], sizes = [10, 1], strides = [1, 1]} : vector<10x5xf32> to vector<10x1xf32>
    %30 = vector.extract_strided_slice %0 {offsets = [4, 0], sizes = [1, 128], strides = [1, 1]} : vector<5x128xf32> to vector<1x128xf32>
    %31 = vector.broadcast %29 : vector<10x1xf32> to vector<10x128xf32>
    %32 = vector.broadcast %30 : vector<1x128xf32> to vector<10x128xf32>
    %33 = arith.mulf %31, %32 : vector<10x128xf32>
    %34 = arith.addf %28, %33 : vector<10x128xf32>
    %cst = arith.constant 0.000000e+00 : f32
    %35 = vector.broadcast %cst : f32 to vector<10x128xf32>
    %36 = arith.maximumf %34, %35 : vector<10x128xf32>
    %c0_5 = arith.constant 0 : index
    %c0_6 = arith.constant 0 : index
    %37 = vector.load %arg4[%c0_5, %c0_6] : memref<10x128xf32, #tpu.memory_space<vmem>>, vector<10x128xf32>
    tpu.vector_store %arg4[%c0_5, %c0_6], %36 {strides = array<i32>} : memref<10x128xf32, #tpu.memory_space<vmem>>, vector<10x128xf32>,
    return
  }
  func.func @transform_0(%arg0: i32) -> (i32, i32) {
    %c0_i32 = arith.constant 0 : i32
    %c0_i32_0 = arith.constant 0 : i32
    return %c0_i32, %arg0 : i32, i32
  }
  func.func @transform_1(%arg0: i32) -> (i32, i32) {
    %c0_i32 = arith.constant 0 : i32
    %c0_i32_0 = arith.constant 0 : i32
    %c0_i32_1 = arith.constant 0 : i32
    return %c0_i32, %c0_i32_0 : i32, i32
  }
  func.func @transform_2(%arg0: i32) -> (i32, i32) {
    %c0_i32 = arith.constant 0 : i32
    %c0_i32_0 = arith.constant 0 : i32
    %c0_i32_1 = arith.constant 0 : i32
    return %c0_i32, %c0_i32_0 : i32, i32
  }
  func.func @transform_3(%arg0: i32) -> (i32, i32) {
    %c0_i32 = arith.constant 0 : i32
    %c0_i32_0 = arith.constant 0 : i32
    return %c0_i32, %arg0 : i32, i32
  }
}

</mosaic_0001>

<bundles_post_ra>
// kernel: linear_add_relu.1
= control target key start
LH: loop header
LB: loop body
LE: loop exit
PB: predicated region body
PF: predicated region fallthrough
CT: control target
= control target key end

     0   :  { %s442_s12 = smov 0   ;;  %s444_s13 = smov 0   ;;  %s505_s0 = inlined_call_operand.vmem [shape: f32[5,240], index: 0, kind: input, shape index: {}]   ;;  %s506_s1 = inlined_call_operand.vmem [shape: f32[10,5], index: 1, kind: input, shape index: {}]   ;;  %s507_s2 = inlined_call_operand.vmem [shape: f32[10,1], index: 2, kind: input, shape index: {}]   ;;  %s508_s3 = inlined_call_operand.vmem [shape: f32[10,240], index: 3, kind: output, shape index: {}]  }
   0x1   :  { %s446_s14 = smov 0  }
   0x2 LB: > { %s455_s15 = sadd.s32 4294967295, %s415_s14   ;;  %s457_s16 = sadd.s32 1, %s415_s14   ;;  %s415_s14 = sphi %s446_s14, %s512_s14   ;;  %s411_s13 = sphi %s444_s13, %s511_s13   ;;  %s407_s12 = sphi %s442_s12, %s510_s12  }
   0x3   : > { %s85_s17 = ssub.s32 %s415_s14, %s457_s16  ;;  %s88_s18 = sadd.s32 1, %s411_s13 }
   0x4   : > { %p86_p0 = scmp.eq.s32.totalorder %s85_s17, 0  ;;  %p98_p1 = scmp.ne.s32.totalorder %s411_s13, %s407_s12 }
   0x5   : > { %p99_p2 = scmp.eq.s32.totalorder %s455_s15, 1  ;;  %p348_p3 = scmp.ge.s32.totalorder %s415_s14, 1 }
   0x6   : > { %s465_s19 = scalar_select %p86_p0, %s411_s13, %s88_s18  }
   0x7   : > { %p467_p4 = por %p99_p2, %p98_p1  ;;  %p136_p5 = scmp.lt.s32.totalorder %s415_s14, 3 }
   0x9   : > { %p137_p6 = pnand %p348_p3, %p136_p5 }
   0xa   : > { %p158_p7 = scmp.lt.s32.totalorder (!%p137_p6), %s455_s15, 1  ;;  %s155_s7 = sand.u32 (!%p137_p6), 1, %s407_s12  }
   0xb   : > { %140 = sbr.rel (%p137_p6) target bundleno = 176 (0xb0), region = 32  ;;  %s349_s8 = sshll.u32 (!%p137_p6), %s155_s7, 4 }
   0xc   : > { %s157_s9 = scalar_lea.vmem (!%p137_p6), [#allocation2], %s349_s8 }
  0x10   : > { %v165_v0 = vld [vmem:[%s507_s2] sm:$0xff]  ;;  %v417_v2 = vmov 0   ;;  %v418_v3 = vmov 1   ;;  %v166_v4 = vld [vmem:[%s507_s2 + $0x8] sm:$0x3]  ;;  %v419_v6 = vmov 2  }
  0x11   : > { %v163_v1 = vld [vmem:[%s506_s1] sm:$0xff]  ;;  %385 = vset.pattern.permute.xlu1 %v417_v2  ;;  %384 = vset.pattern.permute.xlu0 %v417_v2  ;;  %v164_v5 = vld [vmem:[%s506_s1 + $0x8] sm:$0x3]  ;;  %v420_v7 = vmov 3   ;;  %v421_v8 = vmov 4   ;;  %s159_s29 = scalar_select %p158_p7, %s455_s15, 1 }
  0x12   : > { %169 = vperm.xlu0 %384, %v165_v0   ;;  %179 = vperm.xlu1 %385, %v163_v1   ;;  %s352_s10 = sshll.u32 (%p467_p4), %s455_s15, 3 }
  0x13   : > { %386 = vset.pattern.permute.xlu2 %v418_v3  ;;  %s350_s30 = sshll.u32 %s159_s29, 3  ;;  %s256_s14 = scalar_lea.vmem (%p467_p4), %s508_s3, %s352_s10 }
  0x14   : > { %193 = vperm.xlu2 %386, %v163_v1   ;;  %s161_s6 = scalar_lea.vmem %s505_s0, %s350_s30 }
  0x15   : > { %v162_v13 = vld [vmem:[%s161_s6] sm:$0x1f] }
  0x16   : > { %v187_v14 = vperm.slane %v162_v13, 0  ;;  %v200_v18 = vperm.slane %v162_v13, 1  ;;  %v226_v22 = vperm.slane %v162_v13, 3  ;;  %v213_v23 = vperm.slane %v162_v13, 2 }
  0x17   : > { %v239_v25 = vperm.slane %v162_v13, 4 }
  0x1a   : > { %174 = vperm.xlu0 %384, %v166_v4   ;;  %184 = vperm.xlu1 %385, %v164_v5  }
  0x1c   : > { %197 = vperm.xlu2 %386, %v164_v5  }
  0x22   : > { %387 = vset.pattern.permute.xlu0 %v419_v6  ;;  %388 = vset.pattern.permute.xlu1 %v419_v6 }
  0x23   : > { %206 = vperm.xlu0 %387, %v163_v1   ;;  %210 = vperm.xlu1 %388, %v164_v5  }
  0x24   : > { %389 = vset.pattern.permute.xlu2 %v420_v7 }
  0x25   : > { %219 = vperm.xlu2 %389, %v163_v1  }
  0x2b   : > { %390 = vset.pattern.permute.xlu1 %v420_v7  ;;  %392 = vset.pattern.permute.xlu0 %v421_v8 }
  0x2c   : > { %223 = vperm.xlu1 %390, %v164_v5   ;;  %236 = vperm.xlu0 %392, %v164_v5  }
  0x2d   : > { %391 = vset.pattern.permute.xlu2 %v421_v8 }
  0x2e   : > { %232 = vperm.xlu2 %391, %v163_v1  }
  0x6e   : > { %v194_v9 = vpop.permute.xlu2 %193 }
  0x6f   : > { %v201_v20 = vmul.f32 %v200_v18, %v194_v9 }
  0x76   : > { %v198_v10 = vpop.permute.xlu2 %197 }
  0x77   : > { %v202_v36 = vmul.f32 %v200_v18, %v198_v10 }
  0x7f   : > { %v220_v15 = vpop.permute.xlu2 %219 }
  0x80   : > { %v227_v29 = vmul.f32 %v226_v22, %v220_v15 }
  0x84   : > { %v170_v11 = vpop.permute.xlu0 %169  ;;  %v180_v12 = vpop.permute.xlu1 %179 }
  0x85   : > { %v188_v19 = vmul.f32 %v187_v14, %v180_v12 }
  0x87   : > { %v190_v21 = vadd.f32 %v188_v19, %v170_v11 }
  0x88   : > { %v233_v24 = vpop.permute.xlu2 %232 }
  0x89   : > { %v203_v30 = vadd.f32 %v201_v20, %v190_v21  ;;  %v240_v33 = vmul.f32 %v239_v25, %v233_v24 }
  0x8c   : > { %v175_v16 = vpop.permute.xlu0 %174  ;;  %v185_v17 = vpop.permute.xlu1 %184 }
  0x8d   : > { %v189_v26 = vmul.f32 %v187_v14, %v185_v17 }
  0x8f   : > { %v191_v34 = vadd.f32 %v189_v26, %v175_v16 }
  0x91   : > { %v204_v39 = vadd.f32 %v202_v36, %v191_v34 }
  0x95   : > { %v207_v27 = vpop.permute.xlu0 %206  ;;  %v211_v28 = vpop.permute.xlu1 %210 }
  0x96   : > { %v214_v31 = vmul.f32 %v213_v23, %v207_v27  ;;  %v215_v37 = vmul.f32 %v213_v23, %v211_v28 }
  0x98   : > { %v216_v32 = vadd.f32 %v214_v31, %v203_v30  ;;  %v217_v43 = vadd.f32 %v215_v37, %v204_v39 }
  0x9a   : > { %v229_v35 = vadd.f32 %v227_v29, %v216_v32 }
  0x9c   : > { %v242_v38 = vadd.f32 %v240_v33, %v229_v35 }
  0x9e   : > { %v244_v40 = vmax.f32 %v242_v38, 0.0  ;;  %v224_v41 = vpop.permute.xlu1 %223  ;;  %v237_v42 = vpop.permute.xlu0 %236 }
  0x9f   : > { %v228_v44 = vmul.f32 %v226_v22, %v224_v41  ;;  %v241_v45 = vmul.f32 %v239_v25, %v237_v42 }
  0xa0   : > { %246 = vst [vmem:[%s157_s9] sm:$0xff] %v244_v40 }
  0xa1   : > { %v230_v46 = vadd.f32 %v228_v44, %v217_v43 }
  0xa3   : > { %v243_v47 = vadd.f32 %v241_v45, %v230_v46  ;;  %254 = sbr.rel (!%p467_p4) target bundleno = 176 (0xb0), region = 36 }
  0xa5   : > { %v245_v48 = vmax.f32 %v243_v47, 0.0 }
  0xa7   : > { %247 = vst [vmem:[%s157_s9 + $0x8] sm:$0x3] %v245_v48  ;;  %v287_v49 = vld [vmem:[%s157_s9] sm:$0xff] (%p467_p4) }
  0xa8   : > { %288 = vst [vmem:[%s256_s14] sm:$0xff] %v287_v49 }
  0xae   : > { %v289_v50 = vld [vmem:[%s157_s9 + $0x8] sm:$0xff] }
  0xaf   : > { %290 = vst [vmem:[%s256_s14 + $0x10] sm:$0xff] %v289_v50 }
  0xb0 PF: > { %p10_p8 = scmp.ge.s32.totalorder %s457_s16, 4   ;;  %s510_s12 = smov %s411_s13 }
  0xb1   : > { %s511_s13 = smov %s465_s19  ;;  %s512_s14 = smov %s457_s16 }
  0xb2   :  { %12 = sbr.rel (!%p10_p8) target bundleno = 2 (0x2), region = 100 }

</bundles_post_ra>
